<compile_context>
chip_gen: v6e
topology: v6e:2x2x1
jax: 0.10.0
libtpu: 0.0.40
codegen_flags: <defaults>
</compile_context>

<pallas_src>
import functools

import jax
import jax.numpy as jnp
from jax import lax
from jax.experimental import pallas as pl
from jax.experimental.pallas import tpu as pltpu


def _round_up(x, m):
    return ((x + m - 1) // m) * m


def _supcon_proxy_kernel(feat_ref, proto_ref, labels_ref, out_ref,
                         m_ref, l_ref, pos_ref, *,
                         inv_temperature, n_cls, block_c, mask_batch):
    kc = pl.program_id(1)
    n_kc = pl.num_programs(1)

    @pl.when(kc == 0)
    def _():
        m_ref[...] = jnp.full(m_ref.shape, -jnp.inf, dtype=jnp.float32)
        l_ref[...] = jnp.zeros(l_ref.shape, dtype=jnp.float32)
        pos_ref[...] = jnp.zeros(pos_ref.shape, dtype=jnp.float32)

    feats = feat_ref[...]            # [TB, D], native dtype (f32 or bf16)
    protos = proto_ref[...]          # [TC, D], native dtype
    labels = labels_ref[...]         # [TB, 1] int32

    # logits = (features @ prototypes_tile.T) / temperature, f32 accumulation.
    logits = lax.dot_general(
        feats, protos,
        dimension_numbers=(((1,), (1,)), ((), ())),
        preferred_element_type=jnp.float32,
    ) * jnp.float32(inv_temperature)                           # [TB, TC] f32

    # Additive bias row: 0 for real classes, -1e30 for lane-padded classes.
    col_ids = kc * block_c + lax.broadcasted_iota(jnp.int32, (1, block_c), 1)
    bias = jnp.where(col_ids < n_cls,
                     jnp.float32(0.0), jnp.float32(-1e30))     # [1, TC]
    logits = logits + bias                                     # broadcast add

    # Online softmax running stats (per row).
    m_prev = m_ref[...]                                        # [TB, 1]
    m_new = jnp.maximum(m_prev, jnp.max(logits, axis=1, keepdims=True))
    alpha = jnp.exp(m_prev - m_new)
    l_ref[...] = l_ref[...] * alpha + jnp.sum(
        jnp.exp(logits - m_new), axis=1, keepdims=True)
    m_ref[...] = m_new

    # Exactly one positive per row; accumulate its (raw) logit when this class
    # tile contains it.  (Labels are assumed in [0, n_cls) or -1 for padding.)
    pos_hit = jnp.where(labels == col_ids, logits, jnp.float32(0.0))
    pos_ref[...] += jnp.sum(pos_hit, axis=1, keepdims=True)

    @pl.when(kc == n_kc - 1)
    def _():
        # per_row = logit[positive] - logsumexp(logits) over all classes.
        per_row = pos_ref[...] - (m_ref[...] + jnp.log(l_ref[...]))  # [TB, 1]
        if mask_batch:
            per_row = jnp.where(labels >= 0, per_row, jnp.float32(0.0))
        tile_sum = jnp.sum(per_row, keepdims=True)                   # [1, 1]
        out_ref[...] = jnp.broadcast_to(tile_sum.reshape(1, 1, 1),
                                        out_ref.shape)               # (1,8,128)


def supcon_proxy_loss(features, prototypes, labels,
                      temperature=0.07, base_temperature=0.07,
                      block_b=128, block_c=512, mxu_dtype=None):
    """JAX/Pallas equivalent of SupConProxyLoss.forward (returns scalar loss)."""
    B, D = features.shape
    n_cls, D2 = prototypes.shape
    assert D == D2
    if labels.shape[0] != B:
        raise ValueError('Num of labels does not match num of features')

    if mxu_dtype is not None:
        features = features.astype(mxu_dtype)
        prototypes = prototypes.astype(mxu_dtype)

    # ---- Batch tiling (natural D; no feature-dim padding copy). ----
    block_b = max(8, _round_up(int(block_b), 8))
    TB = min(block_b, _round_up(B, 8))
    if TB >= B and TB > 8:
        # Ensure >= 2 grid steps along the parallel axis (v7x megacore).
        TB = _round_up((B + 1) // 2, 8)
    Bp = _round_up(B, TB)
    num_b_tiles = Bp // TB

    # ---- Class tiling (lane dim of the logits: multiple of 128). ----
    block_c = max(128, _round_up(int(block_c), 128))
    TC = min(block_c, _round_up(n_cls, 128))
    Cp = _round_up(n_cls, TC)
    num_c_tiles = Cp // TC

    feats_p = features if Bp == B else jnp.pad(features, ((0, Bp - B), (0, 0)))
    protos_p = (prototypes if Cp == n_cls
                else jnp.pad(prototypes, ((0, Cp - n_cls), (0, 0))))
    labels_p = jnp.full((Bp, 1), -1, jnp.int32).at[:B, 0].set(
        labels.astype(jnp.int32).reshape(-1))

    kernel = functools.partial(
        _supcon_proxy_kernel,
        inv_temperature=1.0 / float(temperature),
        n_cls=int(n_cls),
        block_c=int(TC),
        mask_batch=(Bp != B))

    itemsize = jnp.dtype(feats_p.dtype).itemsize
    # Rough VMEM budget: double-buffered feats/protos/labels + output tile +
    # running-stat scratch + [TB, TC] f32 intermediates, with 2x headroom.
    vmem_est = (2 * TB * D * itemsize      # features (double-buffered)
                + 2 * TC * D * itemsize    # prototypes (double-buffered)
                + 2 * TB * 128 * 4         # labels (lane-padded)
                + 2 * 8 * 128 * 4          # output tile
                + 3 * TB * 128 * 4         # m / l / pos scratch (lane-padded)
                + 6 * TB * TC * 4)         # in-flight [TB, TC] intermediates
    vmem_limit = int(min(max(2 * vmem_est, 16 * 2**20), 64 * 2**20))

    cost = pl.CostEstimate(
        flops=2 * Bp * Cp * D,
        transcendentals=Bp * Cp,
        bytes_accessed=(Bp * D * itemsize
                        + num_b_tiles * Cp * D * itemsize
                        + Bp * 4
                        + num_b_tiles * 8 * 128 * 4))

    partials = pl.pallas_call(
        kernel,
        out_shape=jax.ShapeDtypeStruct((num_b_tiles, 8, 128), jnp.float32),
        grid=(num_b_tiles, num_c_tiles),
        in_specs=[
            pl.BlockSpec((TB, D), lambda i, kc: (i, 0)),    # features (resident over kc)
            pl.BlockSpec((TC, D), lambda i, kc: (kc, 0)),   # prototypes (streamed)
            pl.BlockSpec((TB, 1), lambda i, kc: (i, 0)),    # labels (resident over kc)
        ],
        out_specs=pl.BlockSpec((1, 8, 128), lambda i, kc: (i, 0, 0)),
        scratch_shapes=[
            pltpu.VMEM((TB, 1), jnp.float32),   # running max
            pltpu.VMEM((TB, 1), jnp.float32),   # running sum-exp
            pltpu.VMEM((TB, 1), jnp.float32),   # positive logit
        ],
        compiler_params=pltpu.CompilerParams(
            dimension_semantics=("parallel", "arbitrary"),
            vmem_limit_bytes=vmem_limit),
        cost_estimate=cost,
    )(feats_p, protos_p, labels_p)

    total = jnp.sum(partials[:, 0, 0])
    scale = -(float(temperature) / float(base_temperature))
    return scale * total / jnp.float32(B)


def _reference_loss(features, prototypes, labels,
                    temperature=0.07, base_temperature=0.07):
    # Pure-JAX reference mirroring the PyTorch code.
    n_cls = prototypes.shape[0]
    logits = (features.astype(jnp.float32)
              @ prototypes.astype(jnp.float32).T) / temperature
    logits = logits - jnp.max(logits, axis=1, keepdims=True)
    log_prob = logits - jnp.log(jnp.sum(jnp.exp(logits), axis=1, keepdims=True))
    mask = (labels.reshape(-1, 1) == jnp.arange(n_cls)[None, :]).astype(jnp.float32)
    mean_log_prob_pos = jnp.sum(mask * log_prob, axis=1)
    return -(temperature / base_temperature) * jnp.mean(mean_log_prob_pos)


if __name__ == "__main__":
    key = jax.random.PRNGKey(0)
    k1, k2, k3 = jax.random.split(key, 3)

    B, D, n_cls = 8, 32, 8   # args.n_cls = 8

    features = jax.random.normal(k1, (B, D), dtype=jnp.float32)
    features = features / jnp.linalg.norm(features, axis=1, keepdims=True)
    prototypes = jax.random.normal(k2, (n_cls, D), dtype=jnp.float32)
    prototypes = prototypes / jnp.linalg.norm(prototypes, axis=1, keepdims=True)
    labels = jax.random.randint(k3, (B,), 0, n_cls, dtype=jnp.int32)

    loss = supcon_proxy_loss(features, prototypes, labels)
    jax.block_until_ready(loss)

    ref = _reference_loss(features, prototypes, labels)
    assert jnp.allclose(loss, ref, rtol=1e-5, atol=1e-5), (loss, ref)

    # Also exercise multi-tile grid (batch and class tiling + padding paths).
    B2, D2, n_cls2 = 200, 96, 300
    f2 = jax.random.normal(k1, (B2, D2), dtype=jnp.float32)
    f2 = f2 / jnp.linalg.norm(f2, axis=1, keepdims=True)
    p2 = jax.random.normal(k2, (n_cls2, D2), dtype=jnp.float32)
    p2 = p2 / jnp.linalg.norm(p2, axis=1, keepdims=True)
    l2 = jax.random.randint(k3, (B2,), 0, n_cls2, dtype=jnp.int32)
    loss2 = supcon_proxy_loss(f2, p2, l2, block_b=64, block_c=128)
    jax.block_until_ready(loss2)
    ref2 = _reference_loss(f2, p2, l2)
    assert jnp.allclose(loss2, ref2, rtol=1e-5, atol=1e-5), (loss2, ref2)

    print("KERNEL_OK")
</pallas_src>

<mosaic_0001>
module attributes {stable_mosaic.version = 11 : i64} {
  func.func @_supcon_proxy_kernel(%arg0: i32, %arg1: i32, %arg2: memref<8x32xf32, #tpu.memory_space<vmem>>, %arg3: memref<128x32xf32, #tpu.memory_space<vmem>>, %arg4: memref<8x1xi32, #tpu.memory_space<vmem>>, %arg5: memref<1x8x128xf32, #tpu.memory_space<vmem>>, %arg6: memref<8x1xf32, #tpu.memory_space<vmem>>, %arg7: memref<8x1xf32, #tpu.memory_space<vmem>>, %arg8: memref<8x1xf32, #tpu.memory_space<vmem>>) attributes {dimension_semantics = [#tpu.dimension_semantics<parallel>, #tpu.dimension_semantics<arbitrary>], iteration_bounds = array<i64: 1, 1>, scalar_prefetch = 0 : i64, scratch_operands = 3 : i64, tpu.core_type = #tpu.core_type<tc>, window_params = [{transform_indices = @transform_0, window_bounds = array<i64: 8, 32>}, {transform_indices = @transform_1, window_bounds = array<i64: 128, 32>}, {transform_indices = @transform_2, window_bounds = array<i64: 8, 1>}, {transform_indices = @transform_3, window_bounds = array<i64: 1, 8, 128>}]} {
    %c0_i32 = arith.constant 0 : i32
    %0 = arith.cmpi eq, %arg1, %c0_i32 : i32
    %1 = arith.extui %0 : i1 to i32
    %c0_i32_0 = arith.constant 0 : i32
    %2 = arith.cmpi ne, %1, %c0_i32_0 : i32
    scf.if %2 {
      %cst_27 = arith.constant 0xFF800000 : f32
      %49 = vector.broadcast %cst_27 : f32 to vector<8x1xf32>
      %c0_28 = arith.constant 0 : index
      %c0_29 = arith.constant 0 : index
      %50 = vector.load %arg6[%c0_28, %c0_29] : memref<8x1xf32, #tpu.memory_space<vmem>>, vector<8x1xf32>
      tpu.vector_store %arg6[%c0_28, %c0_29], %49 {strides = array<i32>} : memref<8x1xf32, #tpu.memory_space<vmem>>, vector<8x1xf32>,
      %cst_30 = arith.constant 0.000000e+00 : f32
      %51 = vector.broadcast %cst_30 : f32 to vector<8x1xf32>
      %c0_31 = arith.constant 0 : index
      %c0_32 = arith.constant 0 : index
      %52 = vector.load %arg7[%c0_31, %c0_32] : memref<8x1xf32, #tpu.memory_space<vmem>>, vector<8x1xf32>
      tpu.vector_store %arg7[%c0_31, %c0_32], %51 {strides = array<i32>} : memref<8x1xf32, #tpu.memory_space<vmem>>, vector<8x1xf32>,
      %cst_33 = arith.constant 0.000000e+00 : f32
      %53 = vector.broadcast %cst_33 : f32 to vector<8x1xf32>
      %c0_34 = arith.constant 0 : index
      %c0_35 = arith.constant 0 : index
      %54 = vector.load %arg8[%c0_34, %c0_35] : memref<8x1xf32, #tpu.memory_space<vmem>>, vector<8x1xf32>
      tpu.vector_store %arg8[%c0_34, %c0_35], %53 {strides = array<i32>} : memref<8x1xf32, #tpu.memory_space<vmem>>, vector<8x1xf32>,
    } else {
    }
    %c0 = arith.constant 0 : index
    %c0_1 = arith.constant 0 : index
    %3 = vector.load %arg2[%c0, %c0_1] : memref<8x32xf32, #tpu.memory_space<vmem>>, vector<8x32xf32>
    %c0_2 = arith.constant 0 : index
    %c0_3 = arith.constant 0 : index
    %4 = vector.load %arg3[%c0_2, %c0_3] : memref<128x32xf32, #tpu.memory_space<vmem>>, vector<128x32xf32>
    %c0_4 = arith.constant 0 : index
    %c0_5 = arith.constant 0 : index
    %5 = vector.load %arg4[%c0_4, %c0_5] : memref<8x1xi32, #tpu.memory_space<vmem>>, vector<8x1xi32>
    %cst = arith.constant dense<0.000000e+00> : vector<8x128xf32>
    %6 = tpu.matmul %3, %4, %cst {dimension_numbers = #tpu.dot_dimension_numbers<[1], [1], [0], [0], [0, 0, 1, 0], [], []>} : vector<8x32xf32>, vector<128x32xf32>, vector<8x128xf32> -> vector<8x128xf32>
    %cst_6 = arith.constant 14.2857141 : f32
    %7 = vector.broadcast %cst_6 : f32 to vector<8x128xf32>
    %8 = arith.mulf %6, %7 : vector<8x128xf32>
    %c128_i32 = arith.constant 128 : i32
    %9 = arith.muli %arg1, %c128_i32 : i32
    %10 = tpu.iota {dimensions = array<i32: 1>} : vector<1x128xi32>
    %11 = vector.broadcast %9 : i32 to vector<1x128xi32>
    %12 = arith.addi %11, %10 : vector<1x128xi32>
    %c8_i32 = arith.constant 8 : i32
    %13 = vector.broadcast %c8_i32 : i32 to vector<1x128xi32>
    %14 = arith.cmpi slt, %12, %13 : vector<1x128xi32>
    %cst_7 = arith.constant 0.000000e+00 : f32
    %cst_8 = arith.constant -1.000000e+30 : f32
    %15 = vector.broadcast %cst_7 : f32 to vector<1x128xf32>
    %16 = vector.broadcast %cst_8 : f32 to vector<1x128xf32>
    %17 = arith.select %14, %15, %16 : vector<1x128xi1>, vector<1x128xf32>
    %18 = vector.broadcast %17 : vector<1x128xf32> to vector<8x128xf32>
    %19 = arith.addf %8, %18 : vector<8x128xf32>
    %c0_9 = arith.constant 0 : index
    %c0_10 = arith.constant 0 : index
    %20 = vector.load %arg6[%c0_9, %c0_10] : memref<8x1xf32, #tpu.memory_space<vmem>>, vector<8x1xf32>
    %cst_11 = arith.constant dense<0xFF800000> : vector<8xf32>
    %21 = vector.multi_reduction <maximumf>, %19, %cst_11 [1] : vector<8x128xf32> to vector<8xf32>
    %22 = vector.shape_cast %21 : vector<8xf32> to vector<8x1xf32>
    %23 = arith.maximumf %20, %22 : vector<8x1xf32>
    %24 = arith.subf %20, %23 : vector<8x1xf32>
    %25 = math.exp %24 : vector<8x1xf32>
    %c0_12 = arith.constant 0 : index
    %c0_13 = arith.constant 0 : index
    %26 = vector.load %arg7[%c0_12, %c0_13] : memref<8x1xf32, #tpu.memory_space<vmem>>, vector<8x1xf32>
    %27 = arith.mulf %26, %25 : vector<8x1xf32>
    %28 = vector.broadcast %23 : vector<8x1xf32> to vector<8x128xf32>
    %29 = arith.subf %19, %28 : vector<8x128xf32>
    %30 = math.exp %29 : vector<8x128xf32>
    %cst_14 = arith.constant dense<0.000000e+00> : vector<8xf32>
    %31 = vector.multi_reduction <add>, %30, %cst_14 [1] : vector<8x128xf32> to vector<8xf32>
    %32 = vector.shape_cast %31 : vector<8xf32> to vector<8x1xf32>
    %33 = arith.addf %27, %32 : vector<8x1xf32>
    %c0_15 = arith.constant 0 : index
    %c0_16 = arith.constant 0 : index
    %34 = vector.load %arg7[%c0_15, %c0_16] : memref<8x1xf32, #tpu.memory_space<vmem>>, vector<8x1xf32>
    tpu.vector_store %arg7[%c0_15, %c0_16], %33 {strides = array<i32>} : memref<8x1xf32, #tpu.memory_space<vmem>>, vector<8x1xf32>,
    %c0_17 = arith.constant 0 : index
    %c0_18 = arith.constant 0 : index
    %35 = vector.load %arg6[%c0_17, %c0_18] : memref<8x1xf32, #tpu.memory_space<vmem>>, vector<8x1xf32>
    tpu.vector_store %arg6[%c0_17, %c0_18], %23 {strides = array<i32>} : memref<8x1xf32, #tpu.memory_space<vmem>>, vector<8x1xf32>,
    %36 = vector.broadcast %5 : vector<8x1xi32> to vector<8x128xi32>
    %37 = vector.broadcast %12 : vector<1x128xi32> to vector<8x128xi32>
    %38 = arith.cmpi eq, %36, %37 : vector<8x128xi32>
    %cst_19 = arith.constant 0.000000e+00 : f32
    %39 = vector.broadcast %cst_19 : f32 to vector<8x128xf32>
    %40 = arith.select %38, %19, %39 : vector<8x128xi1>, vector<8x128xf32>
    %c0_20 = arith.constant 0 : index
    %c0_21 = arith.constant 0 : index
    %41 = vector.load %arg8[%c0_20, %c0_21] : memref<8x1xf32, #tpu.memory_space<vmem>>, vector<8x1xf32>
    %cst_22 = arith.constant dense<0.000000e+00> : vector<8xf32>
    %42 = vector.multi_reduction <add>, %40, %cst_22 [1] : vector<8x128xf32> to vector<8xf32>
    %43 = vector.shape_cast %42 : vector<8xf32> to vector<8x1xf32>
    %44 = arith.addf %41, %43 : vector<8x1xf32>
    %c0_23 = arith.constant 0 : index
    %c0_24 = arith.constant 0 : index
    %45 = vector.load %arg8[%c0_23, %c0_24] : memref<8x1xf32, #tpu.memory_space<vmem>>, vector<8x1xf32>
    tpu.vector_store %arg8[%c0_23, %c0_24], %44 {strides = array<i32>} : memref<8x1xf32, #tpu.memory_space<vmem>>, vector<8x1xf32>,
    %c0_i32_25 = arith.constant 0 : i32
    %46 = arith.cmpi eq, %arg1, %c0_i32_25 : i32
    %47 = arith.extui %46 : i1 to i32
    %c0_i32_26 = arith.constant 0 : i32
    %48 = arith.cmpi ne, %47, %c0_i32_26 : i32
    scf.if %48 {
      %c0_27 = arith.constant 0 : index
      %c0_28 = arith.constant 0 : index
      %49 = vector.load %arg8[%c0_27, %c0_28] : memref<8x1xf32, #tpu.memory_space<vmem>>, vector<8x1xf32>
      %c0_29 = arith.constant 0 : index
      %c0_30 = arith.constant 0 : index
      %50 = vector.load %arg6[%c0_29, %c0_30] : memref<8x1xf32, #tpu.memory_space<vmem>>, vector<8x1xf32>
      %c0_31 = arith.constant 0 : index
      %c0_32 = arith.constant 0 : index
      %51 = vector.load %arg7[%c0_31, %c0_32] : memref<8x1xf32, #tpu.memory_space<vmem>>, vector<8x1xf32>
      %52 = math.log %51 : vector<8x1xf32>
      %53 = arith.addf %50, %52 : vector<8x1xf32>
      %54 = arith.subf %49, %53 : vector<8x1xf32>
      %55 = vector.shape_cast %54 : vector<8x1xf32> to vector<1x8x1xf32>
      %cst_33 = arith.constant dense<0.000000e+00> : vector<1xf32>
      %56 = vector.multi_reduction <add>, %55, %cst_33 [1, 2] : vector<1x8x1xf32> to vector<1xf32>
      %57 = vector.shape_cast %56 : vector<1xf32> to vector<1x1x1xf32>
      %58 = vector.extract %57[0, 0, 0] : f32 from vector<1x1x1xf32>
      %59 = vector.broadcast %58 : f32 to vector<1x1xf32>
      %60 = vector.shape_cast %59 : vector<1x1xf32> to vector<1x1x1xf32>
      %61 = vector.shape_cast %60 : vector<1x1x1xf32> to vector<1x1x1xf32>
      %62 = vector.broadcast %61 : vector<1x1x1xf32> to vector<1x8x128xf32>
      %c0_34 = arith.constant 0 : index
      %c0_35 = arith.constant 0 : index
      %c0_36 = arith.constant 0 : index
      %63 = vector.load %arg5[%c0_34, %c0_35, %c0_36] : memref<1x8x128xf32, #tpu.memory_space<vmem>>, vector<1x8x128xf32>
      tpu.vector_store %arg5[%c0_34, %c0_35, %c0_36], %62 {strides = array<i32>} : memref<1x8x128xf32, #tpu.memory_space<vmem>>, vector<1x8x128xf32>,
    } else {
    }
    return
  }
  func.func @transform_0(%arg0: i32, %arg1: i32) -> (i32, i32) {
    %c0_i32 = arith.constant 0 : i32
    %c0_i32_0 = arith.constant 0 : i32
    return %arg0, %c0_i32 : i32, i32
  }
  func.func @transform_1(%arg0: i32, %arg1: i32) -> (i32, i32) {
    %c0_i32 = arith.constant 0 : i32
    %c0_i32_0 = arith.constant 0 : i32
    return %arg1, %c0_i32 : i32, i32
  }
  func.func @transform_2(%arg0: i32, %arg1: i32) -> (i32, i32) {
    %c0_i32 = arith.constant 0 : i32
    %c0_i32_0 = arith.constant 0 : i32
    return %arg0, %c0_i32 : i32, i32
  }
  func.func @transform_3(%arg0: i32, %arg1: i32) -> (i32, i32, i32) {
    %c0_i32 = arith.constant 0 : i32
    %c0_i32_0 = arith.constant 0 : i32
    %c0_i32_1 = arith.constant 0 : i32
    return %arg0, %c0_i32, %c0_i32_0 : i32, i32, i32
  }
}

</mosaic_0001>

<bundles_post_ra>
// kernel: tpu_custom_call.1
= control target key start
LH: loop header
LB: loop body
LE: loop exit
PB: predicated region body
PF: predicated region fallthrough
CT: control target
= control target key end

     0   :  { %vm41_vm0 = vcmask 261120   ;;  %v348_v1 = vmov 0.0   ;;  %vm349_vm1 = vmmov 0   ;;  %v350_v2 = vmov 0   ;;  %s474_s0 = inlined_call_operand.vmem [shape: f32[8,32], index: 0, kind: input, shape index: {}]   ;;  %s475_s1 = inlined_call_operand.vmem [shape: f32[128,32], index: 1, kind: input, shape index: {}]   ;;  %s476_s2 = inlined_call_operand.vmem [shape: s32[8,1], index: 2, kind: input, shape index: {}]   ;;  %s477_s3 = inlined_call_operand.hbm [shape: f32[1,8,128], index: 3, kind: output, shape index: {}]  }
   0x1   :  { %v39_v0 = vld [vmem:[%s475_s1 + $0x78] sm:$0xff]  ;;  %275 = vmatprep.subr.mxu0 %v348_v1  ;;  %307 = vmatprep.mubr.msk.f32.mxu0 %vm349_vm1, %v348_v1  ;;  %v38_v3 = vld [vmem:[%s475_s1 + $0x70] sm:$0xff]  ;;  %v40_v4 = vld [vmem:[%s476_s2] sm:$0xff] }
   0x2   :  { %276 = vmatpush3.xpose.msk.msra.mxu0 %vm41_vm0, %v39_v0  ;;  %319 = vset.pattern.permute.xlu1 %v350_v2 }
   0x3   :  { %277 = vmatprep.subr.mxu0 %v348_v1  ;;  %318 = vset.pattern.permute.xlu0 %v350_v2 }
   0x4   :  { %196 = vperm.xlu1 %319, %v40_v4  }
   0x6   :  { %278 = vmatpush3.xpose.msk.msra.mxu0 %vm41_vm0, %v38_v3 }
   0x7   :  { %8 = vsyncpa [#allocation6], 0  ;;  %279 = vmatprep.subr.mxu0 %v348_v1  ;;  %v37_v5 = vld [vmem:[%s475_s1 + $0x68] sm:$0xff]  ;;  %v36_v6 = vld [vmem:[%s475_s1 + $0x60] sm:$0xff]  ;;  %v165_v20 = vlaneseq  ;;  %v351_v23 = vmov -1e+30  }
   0x8   :  { %v35_v7 = vld [vmem:[%s475_s1 + $0x58] sm:$0xff]  ;;  %v34_v8 = vld [vmem:[%s475_s1 + $0x50] sm:$0xff]  ;;  %v33_v9 = vld [vmem:[%s475_s1 + $0x48] sm:$0xff]  ;;  %vm19_vm3 = vcmask 7168   ;;  %v352_v28 = vmov -inf  }
   0x9   :  { %v32_v10 = vld [vmem:[%s475_s1 + $0x40] sm:$0xff]  ;;  %v31_v11 = vld [vmem:[%s475_s1 + $0x38] sm:$0xff]  ;;  %v30_v12 = vld [vmem:[%s475_s1 + $0x30] sm:$0xff]  ;;  %v166_v21 = vand.u32 127, %v165_v20  ;;  %20 = vst.msk [vmem:[#allocation2] sm:$0xff] %vm19_vm3, %v352_v28 }
   0xa   :  { %280 = vmatpush3.xpose.msk.msra.mxu0 %vm41_vm0, %v37_v5  ;;  %v29_v13 = vld [vmem:[%s475_s1 + $0x28] sm:$0xff]  ;;  %v28_v14 = vld [vmem:[%s475_s1 + $0x20] sm:$0xff]  ;;  %v27_v15 = vld [vmem:[%s475_s1 + $0x18] sm:$0xff]  ;;  %21 = vst.msk [vmem:[#allocation3] sm:$0xff] %vm19_vm3, %v348_v1 }
   0xb   :  { %281 = vmatprep.subr.mxu0 %v348_v1  ;;  %v26_v16 = vld [vmem:[%s475_s1 + $0x10] sm:$0xff]  ;;  %v25_v17 = vld [vmem:[%s475_s1 + $0x8] sm:$0xff]  ;;  %v24_v18 = vld [vmem:[%s475_s1] sm:$0xff]  ;;  %vm169_vm2 = vcmp.lt.s32.totalorder %v166_v21, 8  ;;  %22 = vst.msk [vmem:[#allocation4] sm:$0xff] %vm19_vm3, %v348_v1 }
   0xc   :  { %v23_v19 = vld [vmem:[%s474_s0] sm:$0xff]  ;;  %v170_v24 = vsel %vm169_vm2, 0.0, %v351_v23  ;;  %s353_s0 = smov [#allocation5]  }
   0xd   :  { %s233_s1 = sshll.u32 %s353_s0, 4  ;;  %s234_s1 = int_to_ptr.vmem [resolvable:$true] %s233_s1 }
   0xe   :  { %282 = vmatpush3.xpose.msk.msra.mxu0 %vm41_vm0, %v36_v6  ;;  %s326_s21 = scalar_lea.vmem %s234_s1, 128  ;;  %p331_p1 = scmp.lt.s32.totalorder %s234_s1, %s234_s1 }
   0xf   :  { %283 = vmatprep.subr.mxu0 %v348_v1  ;;  %p327_p0 = scmp.ne.s32.totalorder %s234_s1, %s326_s21  ;;  %p332_p2 = scmp.lt.s32.totalorder %s326_s21, %s326_s21 }
  0x10   :  { %v172_v29 = vld [vmem:[#allocation2] sm:$0xff] }
  0x11   :  { %v179_v41 = vld [vmem:[#allocation3] sm:$0xff]  ;;  %p333_p3 = por %p332_p2, %p331_p1 }
  0x12   :  { %284 = vmatpush3.xpose.msk.msra.mxu0 %vm41_vm0, %v35_v7  ;;  %v200_v45 = vld [vmem:[#allocation4] sm:$0xff] }
  0x13   :  { %285 = vmatprep.subr.mxu0 %v348_v1  ;;  %p334_p4 = pnand %p333_p3, %p327_p0 }
  0x16   :  { %286 = vmatpush3.xpose.msk.msra.mxu0 %vm41_vm0, %v34_v8 }
  0x17   :  { %287 = vmatprep.subr.mxu0 %v348_v1 }
  0x1a   :  { %288 = vmatpush3.xpose.msk.msra.mxu0 %vm41_vm0, %v33_v9 }
  0x1b   :  { %289 = vmatprep.subr.mxu0 %v348_v1 }
  0x1e   :  { %290 = vmatpush3.xpose.msk.msra.mxu0 %vm41_vm0, %v32_v10 }
  0x1f   :  { %291 = vmatprep.subr.mxu0 %v348_v1 }
  0x22   :  { %292 = vmatpush3.xpose.msk.msra.mxu0 %vm41_vm0, %v31_v11 }
  0x23   :  { %293 = vmatprep.subr.mxu0 %v348_v1 }
  0x26   :  { %294 = vmatpush3.xpose.msk.msra.mxu0 %vm41_vm0, %v30_v12 }
  0x27   :  { %295 = vmatprep.subr.mxu0 %v348_v1 }
  0x2a   :  { %296 = vmatpush3.xpose.msk.msra.mxu0 %vm41_vm0, %v29_v13 }
  0x2b   :  { %297 = vmatprep.subr.mxu0 %v348_v1 }
  0x2e   :  { %298 = vmatpush3.xpose.msk.msra.mxu0 %vm41_vm0, %v28_v14 }
  0x2f   :  { %299 = vmatprep.subr.mxu0 %v348_v1 }
  0x32   :  { %300 = vmatpush3.xpose.msk.msra.mxu0 %vm41_vm0, %v27_v15 }
  0x33   :  { %301 = vmatprep.subr.mxu0 %v348_v1 }
  0x36   :  { %302 = vmatpush3.xpose.msk.msra.mxu0 %vm41_vm0, %v26_v16 }
  0x37   :  { %303 = vmatprep.subr.mxu0 %v348_v1 }
  0x3a   :  { %304 = vmatpush3.xpose.msk.msra.mxu0 %vm41_vm0, %v25_v17 }
  0x3b   :  { %305 = vmatprep.subr.mxu0 %v348_v1 }
  0x3e   :  { %306 = vmatpush3.xpose.msk.msra.mxu0 %vm41_vm0, %v24_v18 }
  0x41   :  { %308 = vmatmul.mubr.msk.f32.vlgmr.msra.gmra.mxu0 %vm41_vm0, %v23_v19 }
  0x7f   :  { %v197_v36 = vpop.permute.xlu1 %196 }
  0x80   :  { %vm198_vm4 = vcmp.eq.s32.totalorder %v197_v36, %v166_v21 }
 0x101   :  { %v159_v22 = vpop.f32.mrf.mxu0 }
 0x102   :  { %v163_v25 = vmul.f32 14.285714, %v159_v22 }
 0x103   :  { %v309_v26 = vpop.f32.mrf.mxu0 }
 0x104   :  { %v171_v27 = vadd.f32 %v170_v24, %v163_v25 }
 0x106   :  { %173 = vmax.xlane.f32.xlu0 %v171_v27  ;;  %v199_v38 = vsel %vm198_vm4, %v171_v27, 0.0 }
 0x18f   :  { %v174_v30 = vpop.xlane.xlu0 %173 }
 0x190   :  { %v175_v31 = vmax.f32 %v172_v29, %v174_v30 }
 0x192   :  { %v176_v32 = vsub.f32 %v172_v29, %v175_v31  ;;  %194 = vst.msk [vmem:[#allocation2] sm:$0xff] %vm19_vm3, %v175_v31  ;;  %183 = vperm.xlu0 %318, %v175_v31  }
 0x194   :  { %v177_v39 = vmul.f32 1.442695, %v176_v32 }
 0x199   :  { %v209_v51 = vld [vmem:[#allocation2] sm:$0xff] }
 0x20d   :  { %v184_v33 = vpop.permute.xlu0 %183 }
 0x20e   :  { %v186_v34 = vsub.f32 %v171_v27, %v184_v33 }
 0x210   :  { %v187_v35 = vmul.f32 1.442695, %v186_v34 }
 0x212   :  { %320 = vpow2.f32 %v187_v35 }
 0x213   :  { %322 = vpow2.f32 %v177_v39 }
 0x21f   :  { %v321_v37 = vpop.eup %320 }
 0x220   :  { %189 = vadd.xlane.f32.xlu1 %v321_v37  ;;  %v323_v40 = vpop.eup %322 }
 0x221   :  { %v180_v42 = vmul.f32 %v323_v40, %v179_v41 }
 0x224   :  { %201 = vadd.xlane.f32.xlu1 %v199_v38 }
 0x2a9   :  { %v190_v43 = vpop.xlane.xlu1 %189 }
 0x2aa   :  { %v191_v44 = vadd.f32 %v190_v43, %v180_v42 }
 0x2ac   :  { %193 = vst.msk [vmem:[#allocation3] sm:$0xff] %vm19_vm3, %v191_v44 }
 0x2ad   :  { %v202_v46 = vpop.xlane.xlu1 %201 }
 0x2ae   :  { %v203_v47 = vadd.f32 %v202_v46, %v200_v45 }
 0x2b0   :  { %204 = vst.msk [vmem:[#allocation4] sm:$0xff] %vm19_vm3, %v203_v47 }
 0x2b3   :  { %v210_v48 = vld [vmem:[#allocation3] sm:$0xff] }
 0x2b4   :  { %324 = vlog2.f32 %v210_v48 }
 0x2b7   :  { %v208_v53 = vld [vmem:[#allocation4] sm:$0xff] }
 0x2c1   :  { %v325_v49 = vpop.eup %324 }
 0x2c2   :  { %v212_v50 = vmul.f32 0.6931472, %v325_v49 }
 0x2c4   :  { %v213_v52 = vadd.f32 %v212_v50, %v209_v51 }
 0x2c6   :  { %v214_v54 = vsub.f32 %v208_v53, %v213_v52 }
 0x2c8   :  { %v215_v55 = vsel %vm19_vm3, %v214_v54, 0.0 }
 0x2c9   :  { %216 = vadd.xlane.f32.xlu1 %v215_v55 }
 0x352   :  { %v217_v56 = vpop.xlane.xlu1 %216 }
 0x353   :  { %v218_v57 = vrot.slane %v217_v56, 4 }
 0x355   :  { %v219_v58 = vadd.f32 %v218_v57, %v217_v56 }
 0x357   :  { %v220_v59 = vrot.slane %v219_v58, 2 }
 0x359   :  { %v221_v60 = vadd.f32 %v220_v59, %v219_v58 }
 0x35b   :  { %v222_v61 = vrot.slane %v221_v60, 1 }
 0x35d   :  { %v223_v62 = vadd.f32 %v222_v61, %v221_v60 }
 0x35f   :  { %310 = vpush %v223_v62 }
 0x390   :  { %s311_s20 = spop %310 }
 0x391   :  { %v225_v63 = vstv %s311_s20 }
 0x392   :  { %226 = vst [vmem:[#allocation5] sm:$0xff] %v225_v63 }
 0x393   :  { %337 = shalt.err (!%p334_p4)
}
 0x394   :  { %236 = dma.vmem_to_hbm [thread:$0]  %s234_s1, 128, %s477_s3, [#allocation6]  }
 0x395   :  { %346 = dma.done.wait [#allocation6], 128  }
 0x396   :  { %347 = vsyncadd [#allocation6], 4294967168 }
 0x397   :  { %240 = vsyncpa [#allocation6], 1 }

</bundles_post_ra>
